<compile_context>
chip_gen: v6e
topology: v6e:2x2x1
jax: 0.10.0
libtpu: 0.0.40
codegen_flags: <defaults>
</compile_context>

<pallas_src>
import numpy as np
import jax
import jax.numpy as jnp
from jax import lax
from jax.experimental import pallas as pl
from jax.experimental.pallas import tpu as pltpu


def _round_up(x, m):
    return ((x + m - 1) // m) * m


def _conv3x3_valid_as_dense(w_hwio, in_h, in_w):
    """Fold a VALID 3x3 conv into a dense matrix M so that

        out_flat[(oi*OW + oj)*CO + co]  =  (M @ in_flat)[...],
        in_flat[(ih*IW + iw)*CI + ci]

    One-time weight preprocessing (no per-sample compute)."""
    kh_n, kw_n, ci_n, co_n = w_hwio.shape
    oh, ow = in_h - kh_n + 1, in_w - kw_n + 1
    rows, cols, widx = [], [], []
    for oi in range(oh):
        for oj in range(ow):
            for dh in range(kh_n):
                for dw in range(kw_n):
                    for ci in range(ci_n):
                        for co in range(co_n):
                            rows.append((oi * ow + oj) * co_n + co)
                            cols.append(((oi + dh) * in_w + (oj + dw)) * ci_n + ci)
                            widx.append((dh, dw, ci, co))
    widx = np.asarray(widx)
    vals = w_hwio[widx[:, 0], widx[:, 1], widx[:, 2], widx[:, 3]]
    m = jnp.zeros((oh * ow * co_n, in_h * in_w * ci_n), jnp.float32)
    return m.at[np.asarray(rows), np.asarray(cols)].set(vals.astype(jnp.float32))


def net1_kernel(x_ref, m1_ref, b1_ref, m2_ref, b2_ref, wfc_ref, bfc_ref, out_ref):
    # x_ref:   (36, TN)  flattened 6x6 input, batch on lanes
    # m1_ref:  (96, 36)  conv1 as dense matmul   b1_ref: (96, 1)
    # m2_ref:  (64, 96)  conv2 as dense matmul   b2_ref: (64, 1)
    # wfc_ref: (16, 1)   fc weight (column)      bfc_ref: (1, 1)
    # out_ref: (1, TN)   lane-dense output
    x = x_ref[...]

    # conv1 (1->6, 3x3, valid) + ReLU : one MXU matmul, result (96, TN)
    h1 = jnp.maximum(
        jnp.dot(m1_ref[...], x, preferred_element_type=jnp.float32) + b1_ref[...],
        0.0)

    # conv2 (6->16, 3x3, valid) + ReLU : one MXU matmul, result (64, TN)
    h2 = jnp.maximum(
        jnp.dot(m2_ref[...], h1, preferred_element_type=jnp.float32) + b2_ref[...],
        0.0)

    # max-pool 2x2 over the 2x2 spatial map: rows are (pos*16 + channel)
    pooled = jnp.maximum(
        jnp.maximum(h2[0:16, :], h2[16:32, :]),
        jnp.maximum(h2[32:48, :], h2[48:64, :]),
    )                                                        # (16, TN)

    # fc1 (16 -> 1): VPU multiply + sublane reduce -> lane-dense (1, TN)
    out_ref[...] = (
        jnp.sum(pooled * wfc_ref[...], axis=0, keepdims=True) + bfc_ref[...]
    )


def net1_forward(x_nchw, params, *, tile_n=512):
    """x_nchw: (N, 1, 6, 6) float32 (PyTorch layout). Returns (N, 1) float32."""
    w1_hwio, b1, w2_hwio, b2, wfc, bfc = params
    n = x_nchw.shape[0]

    # ---- one-time weight preprocessing (layout only, no per-sample compute) ----
    m1 = _conv3x3_valid_as_dense(w1_hwio, 6, 6)          # (96, 36)
    m2 = _conv3x3_valid_as_dense(w2_hwio, 4, 4)          # (64, 96)
    b1_col = jnp.tile(b1.astype(jnp.float32), 16).reshape(96, 1)
    b2_col = jnp.tile(b2.astype(jnp.float32), 4).reshape(64, 1)
    wfc_col = wfc.astype(jnp.float32).reshape(16, 1)
    bfc_2d = bfc.astype(jnp.float32).reshape(1, 1)

    # ---- lane-dense input slab: (36, N_pad), batch on lanes ----
    x_flat = x_nchw.astype(jnp.float32).reshape(n, 36)   # C=1 -> index ih*6+iw
    x_t = x_flat.T                                       # (36, N)
    tn = min(int(tile_n), _round_up(max(n, 1), 128))
    tn = _round_up(tn, 128)
    n_pad = _round_up(n, tn)
    if n_pad != n:
        x_t = jnp.pad(x_t, ((0, 0), (0, n_pad - n)))

    out = pl.pallas_call(
        net1_kernel,
        out_shape=jax.ShapeDtypeStruct((1, n_pad), jnp.float32),
        grid=(n_pad // tn,),
        in_specs=[
            pl.BlockSpec((36, tn), lambda i: (0, i)),    # input tile (batch on lanes)
            pl.BlockSpec((96, 36), lambda i: (0, 0)),    # conv1 dense weights
            pl.BlockSpec((96, 1), lambda i: (0, 0)),     # conv1 bias (per row)
            pl.BlockSpec((64, 96), lambda i: (0, 0)),    # conv2 dense weights
            pl.BlockSpec((64, 1), lambda i: (0, 0)),     # conv2 bias (per row)
            pl.BlockSpec((16, 1), lambda i: (0, 0)),     # fc weight column
            pl.BlockSpec((1, 1), lambda i: (0, 0)),      # fc bias
        ],
        out_specs=pl.BlockSpec((1, tn), lambda i: (0, i)),
        compiler_params=pltpu.CompilerParams(
            dimension_semantics=("parallel",),           # shard batch tiles on v7x TCs
            vmem_limit_bytes=32 * 1024 * 1024,
        ),
    )(x_t, m1, b1_col, m2, b2_col, wfc_col, bfc_2d)

    # strip batch padding, back to PyTorch (N, 1) layout (pure layout plumbing)
    return out[:, :n].T


def net1_reference(x_nchw, params):
    """Pure-JAX reference with the same semantics as the PyTorch module."""
    w1_hwio, b1, w2_hwio, b2, wfc, bfc = params
    x = jnp.transpose(x_nchw, (0, 2, 3, 1)).astype(jnp.float32)
    dn = ("NHWC", "HWIO", "NHWC")
    y = lax.conv_general_dilated(x, w1_hwio, (1, 1), "VALID", dimension_numbers=dn)
    y = jax.nn.relu(y + b1.reshape(1, 1, 1, -1))
    y = lax.conv_general_dilated(y, w2_hwio, (1, 1), "VALID", dimension_numbers=dn)
    y = jax.nn.relu(y + b2.reshape(1, 1, 1, -1))
    y = jnp.max(y, axis=(1, 2))                 # 2x2 max-pool over the 2x2 map
    return y @ wfc + bfc.reshape(1, 1)


def init_params(key):
    """Deterministic init, PyTorch-style uniform(-1/sqrt(fan_in), 1/sqrt(fan_in))."""
    ks = jax.random.split(key, 6)

    def u(k, shape, fan_in):
        bound = 1.0 / jnp.sqrt(jnp.float32(fan_in))
        return jax.random.uniform(k, shape, jnp.float32, -bound, bound)

    w1 = u(ks[0], (3, 3, 1, 6), 1 * 3 * 3)      # HWIO
    b1 = u(ks[1], (6,), 1 * 3 * 3)
    w2 = u(ks[2], (3, 3, 6, 16), 6 * 3 * 3)     # HWIO
    b2 = u(ks[3], (16,), 6 * 3 * 3)
    wfc = u(ks[4], (16, 1), 16)                 # (in, out) = fc1.weight.T
    bfc = u(ks[5], (1,), 16)
    return (w1, b1, w2, b2, wfc, bfc)


if __name__ == "__main__":
    key = jax.random.PRNGKey(0)
    k_x, k_x2, k_p = jax.random.split(key, 3)
    params = init_params(k_p)

    # Small PyTorch-style input: NCHW, batch=2, channels=1, spatial=6x6
    # (6x6 is what fc1(in_features=16) implies for this module).
    x = jax.random.normal(k_x, (2, 1, 6, 6), jnp.float32)
    out = jax.block_until_ready(net1_forward(x, params))
    ref = net1_reference(x, params)
    assert out.shape == (2, 1), out.shape
    assert jnp.allclose(out, ref, atol=1e-3, rtol=1e-3), (out, ref)

    # Larger batch: exercises batch padding + the multi-step pipelined grid.
    x_big = jax.random.normal(k_x2, (600, 1, 6, 6), jnp.float32)
    out_big = jax.block_until_ready(net1_forward(x_big, params))
    ref_big = net1_reference(x_big, params)
    assert out_big.shape == (600, 1), out_big.shape
    assert jnp.allclose(out_big, ref_big, atol=1e-3, rtol=1e-3)

    print("KERNEL_OK")
</pallas_src>

<mosaic_0001>
module attributes {stable_mosaic.version = 11 : i64} {
  func.func @net1_kernel(%arg0: i32, %arg1: memref<36x128xf32, #tpu.memory_space<vmem>>, %arg2: memref<96x36xf32, #tpu.memory_space<vmem>>, %arg3: memref<96x1xf32, #tpu.memory_space<vmem>>, %arg4: memref<64x96xf32, #tpu.memory_space<vmem>>, %arg5: memref<64x1xf32, #tpu.memory_space<vmem>>, %arg6: memref<16x1xf32, #tpu.memory_space<vmem>>, %arg7: memref<1x1xf32, #tpu.memory_space<vmem>>, %arg8: memref<1x128xf32, #tpu.memory_space<vmem>>) attributes {dimension_semantics = [#tpu.dimension_semantics<parallel>], iteration_bounds = array<i64: 1>, scalar_prefetch = 0 : i64, scratch_operands = 0 : i64, tpu.core_type = #tpu.core_type<tc>, window_params = [{transform_indices = @transform_0, window_bounds = array<i64: 36, 128>}, {pipeline_mode = #tpu.pipeline_mode<synchronous>, transform_indices = @transform_1, window_bounds = array<i64: 96, 36>}, {pipeline_mode = #tpu.pipeline_mode<synchronous>, transform_indices = @transform_2, window_bounds = array<i64: 96, 1>}, {pipeline_mode = #tpu.pipeline_mode<synchronous>, transform_indices = @transform_3, window_bounds = array<i64: 64, 96>}, {pipeline_mode = #tpu.pipeline_mode<synchronous>, transform_indices = @transform_4, window_bounds = array<i64: 64, 1>}, {pipeline_mode = #tpu.pipeline_mode<synchronous>, transform_indices = @transform_5, window_bounds = array<i64: 16, 1>}, {pipeline_mode = #tpu.pipeline_mode<synchronous>, transform_indices = @transform_6, window_bounds = array<i64: 1, 1>}, {transform_indices = @transform_7, window_bounds = array<i64: 1, 128>}]} {
    %c0 = arith.constant 0 : index
    %c0_0 = arith.constant 0 : index
    %0 = vector.load %arg1[%c0, %c0_0] : memref<36x128xf32, #tpu.memory_space<vmem>>, vector<36x128xf32>
    %c0_1 = arith.constant 0 : index
    %c0_2 = arith.constant 0 : index
    %1 = vector.load %arg2[%c0_1, %c0_2] : memref<96x36xf32, #tpu.memory_space<vmem>>, vector<96x36xf32>
    %cst = arith.constant dense<0.000000e+00> : vector<96x128xf32>
    %2 = tpu.matmul %1, %0, %cst {dimension_numbers = #tpu.dot_dimension_numbers<[1], [0], [0], [1], [0, 0, 1, 1], [], []>} : vector<96x36xf32>, vector<36x128xf32>, vector<96x128xf32> -> vector<96x128xf32>
    %c0_3 = arith.constant 0 : index
    %c0_4 = arith.constant 0 : index
    %3 = vector.load %arg3[%c0_3, %c0_4] : memref<96x1xf32, #tpu.memory_space<vmem>>, vector<96x1xf32>
    %4 = vector.broadcast %3 : vector<96x1xf32> to vector<96x128xf32>
    %5 = arith.addf %2, %4 : vector<96x128xf32>
    %cst_5 = arith.constant 0.000000e+00 : f32
    %6 = vector.broadcast %cst_5 : f32 to vector<96x128xf32>
    %7 = arith.maximumf %5, %6 : vector<96x128xf32>
    %c0_6 = arith.constant 0 : index
    %c0_7 = arith.constant 0 : index
    %8 = vector.load %arg4[%c0_6, %c0_7] : memref<64x96xf32, #tpu.memory_space<vmem>>, vector<64x96xf32>
    %cst_8 = arith.constant dense<0.000000e+00> : vector<64x128xf32>
    %9 = tpu.matmul %8, %7, %cst_8 {dimension_numbers = #tpu.dot_dimension_numbers<[1], [0], [0], [1], [0, 0, 1, 1], [], []>} : vector<64x96xf32>, vector<96x128xf32>, vector<64x128xf32> -> vector<64x128xf32>
    %c0_9 = arith.constant 0 : index
    %c0_10 = arith.constant 0 : index
    %10 = vector.load %arg5[%c0_9, %c0_10] : memref<64x1xf32, #tpu.memory_space<vmem>>, vector<64x1xf32>
    %11 = vector.broadcast %10 : vector<64x1xf32> to vector<64x128xf32>
    %12 = arith.addf %9, %11 : vector<64x128xf32>
    %cst_11 = arith.constant 0.000000e+00 : f32
    %13 = vector.broadcast %cst_11 : f32 to vector<64x128xf32>
    %14 = arith.maximumf %12, %13 : vector<64x128xf32>
    %15 = vector.extract_strided_slice %14 {offsets = [0, 0], sizes = [16, 128], strides = [1, 1]} : vector<64x128xf32> to vector<16x128xf32>
    %16 = vector.extract_strided_slice %14 {offsets = [16, 0], sizes = [16, 128], strides = [1, 1]} : vector<64x128xf32> to vector<16x128xf32>
    %17 = arith.maximumf %15, %16 : vector<16x128xf32>
    %18 = vector.extract_strided_slice %14 {offsets = [32, 0], sizes = [16, 128], strides = [1, 1]} : vector<64x128xf32> to vector<16x128xf32>
    %19 = vector.extract_strided_slice %14 {offsets = [48, 0], sizes = [16, 128], strides = [1, 1]} : vector<64x128xf32> to vector<16x128xf32>
    %20 = arith.maximumf %18, %19 : vector<16x128xf32>
    %21 = arith.maximumf %17, %20 : vector<16x128xf32>
    %c0_12 = arith.constant 0 : index
    %c0_13 = arith.constant 0 : index
    %22 = vector.load %arg6[%c0_12, %c0_13] : memref<16x1xf32, #tpu.memory_space<vmem>>, vector<16x1xf32>
    %23 = vector.broadcast %22 : vector<16x1xf32> to vector<16x128xf32>
    %24 = arith.mulf %21, %23 : vector<16x128xf32>
    %cst_14 = arith.constant dense<0.000000e+00> : vector<128xf32>
    %25 = vector.multi_reduction <add>, %24, %cst_14 [0] : vector<16x128xf32> to vector<128xf32>
    %26 = vector.shape_cast %25 : vector<128xf32> to vector<1x128xf32>
    %c0_15 = arith.constant 0 : index
    %c0_16 = arith.constant 0 : index
    %27 = vector.load %arg7[%c0_15, %c0_16] : memref<1x1xf32, #tpu.memory_space<vmem>>, vector<1x1xf32>
    %28 = vector.broadcast %27 : vector<1x1xf32> to vector<1x128xf32>
    %29 = arith.addf %26, %28 : vector<1x128xf32>
    %c0_17 = arith.constant 0 : index
    %c0_18 = arith.constant 0 : index
    %30 = vector.load %arg8[%c0_17, %c0_18] : memref<1x128xf32, #tpu.memory_space<vmem>>, vector<1x128xf32>
    tpu.vector_store %arg8[%c0_17, %c0_18], %29 {strides = array<i32>} : memref<1x128xf32, #tpu.memory_space<vmem>>, vector<1x128xf32>,
    return
  }
  func.func @transform_0(%arg0: i32) -> (i32, i32) {
    %c0_i32 = arith.constant 0 : i32
    %c0_i32_0 = arith.constant 0 : i32
    return %c0_i32, %arg0 : i32, i32
  }
  func.func @transform_1(%arg0: i32) -> (i32, i32) {
    %c0_i32 = arith.constant 0 : i32
    %c0_i32_0 = arith.constant 0 : i32
    %c0_i32_1 = arith.constant 0 : i32
    return %c0_i32, %c0_i32_0 : i32, i32
  }
  func.func @transform_2(%arg0: i32) -> (i32, i32) {
    %c0_i32 = arith.constant 0 : i32
    %c0_i32_0 = arith.constant 0 : i32
    %c0_i32_1 = arith.constant 0 : i32
    return %c0_i32, %c0_i32_0 : i32, i32
  }
  func.func @transform_3(%arg0: i32) -> (i32, i32) {
    %c0_i32 = arith.constant 0 : i32
    %c0_i32_0 = arith.constant 0 : i32
    %c0_i32_1 = arith.constant 0 : i32
    return %c0_i32, %c0_i32_0 : i32, i32
  }
  func.func @transform_4(%arg0: i32) -> (i32, i32) {
    %c0_i32 = arith.constant 0 : i32
    %c0_i32_0 = arith.constant 0 : i32
    %c0_i32_1 = arith.constant 0 : i32
    return %c0_i32, %c0_i32_0 : i32, i32
  }
  func.func @transform_5(%arg0: i32) -> (i32, i32) {
    %c0_i32 = arith.constant 0 : i32
    %c0_i32_0 = arith.constant 0 : i32
    %c0_i32_1 = arith.constant 0 : i32
    return %c0_i32, %c0_i32_0 : i32, i32
  }
  func.func @transform_6(%arg0: i32) -> (i32, i32) {
    %c0_i32 = arith.constant 0 : i32
    %c0_i32_0 = arith.constant 0 : i32
    %c0_i32_1 = arith.constant 0 : i32
    return %c0_i32, %c0_i32_0 : i32, i32
  }
  func.func @transform_7(%arg0: i32) -> (i32, i32) {
    %c0_i32 = arith.constant 0 : i32
    %c0_i32_0 = arith.constant 0 : i32
    return %c0_i32, %arg0 : i32, i32
  }
}

</mosaic_0001>

<bundles_post_ra>
// kernel: tpu_custom_call.1
= control target key start
LH: loop header
LB: loop body
LE: loop exit
PB: predicated region body
PF: predicated region fallthrough
CT: control target
= control target key end

     0   :  { %s900_s0 = inlined_call_operand.vmem [shape: f32[36,128], index: 0, kind: input, shape index: {}]   ;;  %s901_s1 = inlined_call_operand.vmem [shape: f32[96,36], index: 1, kind: input, shape index: {}]   ;;  %s902_s2 = inlined_call_operand.vmem [shape: f32[96,1], index: 2, kind: input, shape index: {}]   ;;  %s903_s3 = inlined_call_operand.vmem [shape: f32[64,96], index: 3, kind: input, shape index: {}]   ;;  %s904_s4 = inlined_call_operand.vmem [shape: f32[64,1], index: 4, kind: input, shape index: {}]   ;;  %s905_s5 = inlined_call_operand.vmem [shape: f32[16,1], index: 5, kind: input, shape index: {}]   ;;  %s906_s6 = inlined_call_operand.<no memory space> [shape: f32[1,1], index: 6, kind: input, shape index: {}]   ;;  %s907_s7 = inlined_call_operand.hbm [shape: f32[1,128], index: 7, kind: output, shape index: {}]  }
   0x1   :  { %v12_v0 = vstv %s906_s6 }
   0x2   :  { %13 = vst [vmem:[#allocation2] sm:$0x1] %v12_v0 }
   0x3   :  { %v33_v1 = vld [vmem:[%s900_s0 + $0x20] sm:$0xf]  ;;  %vm155_vm0 = vcmask 1043456   ;;  %v32_v2 = vld [vmem:[%s900_s0 + $0x18] sm:$0xff]  ;;  %vm118_vm1 = vcmask 293888   ;;  %v31_v4 = vld [vmem:[%s900_s0 + $0x10] sm:$0xff] }
   0x4   :  { %601 = vmatprep.subr.msk.mxu0 %vm155_vm0, %v33_v1  ;;  %v34_v3 = vld [vmem:[%s901_s1] sm:$0xff]  ;;  %v691_v5 = vmov 0   ;;  %v30_v6 = vld [vmem:[%s900_s0 + $0x8] sm:$0xff]  ;;  %v57_v7 = vld [vmem:[%s902_s2 + $0x58] sm:$0xff] }
   0x5   :  { %602 = vmatpush3.msk.msra.mxu0 %vm155_vm0, %v33_v1  ;;  %611 = vmatprep.mubr.msk.f32.mxu0 %vm118_vm1, %v34_v3  ;;  %v29_v8 = vld [vmem:[%s900_s0] sm:$0xff]  ;;  %v55_v9 = vld [vmem:[%s902_s2 + $0x48] sm:$0xff]  ;;  %v56_v10 = vld [vmem:[%s902_s2 + $0x50] sm:$0xff] }
   0x6   :  { %603 = vmatprep.subr.mxu0 %v32_v2  ;;  %667 = vset.pattern.permute.xlu0 %v691_v5  ;;  %v35_v11 = vld [vmem:[%s901_s1 + $0x8] sm:$0xff]  ;;  %v54_v12 = vld [vmem:[%s902_s2 + $0x40] sm:$0xff]  ;;  %v36_v13 = vld [vmem:[%s901_s1 + $0x10] sm:$0xff] }
   0x7   :  { %604 = vmatpush3.msra.mxu0 %v32_v2  ;;  %668 = vset.pattern.permute.xlu1 %v691_v5  ;;  %v53_v14 = vld [vmem:[%s902_s2 + $0x38] sm:$0xff]  ;;  %v52_v16 = vld [vmem:[%s902_s2 + $0x30] sm:$0xff]  ;;  %v38_v17 = vld [vmem:[%s901_s1 + $0x20] sm:$0xff] }
   0x8   :  { %605 = vmatprep.subr.mxu0 %v31_v4  ;;  %115 = vperm.xlu0 %667, %v57_v7   ;;  %v37_v15 = vld [vmem:[%s901_s1 + $0x18] sm:$0xff] }
   0x9   :  { %606 = vmatpush3.msra.mxu0 %v31_v4  ;;  %105 = vperm.xlu1 %668, %v55_v9  }
   0xa   :  { %607 = vmatprep.subr.mxu0 %v30_v6 }
   0xb   :  { %608 = vmatpush3.msra.mxu0 %v30_v6 }
   0xc   :  { %609 = vmatprep.subr.mxu0 %v29_v8  ;;  %110 = vperm.xlu0 %667, %v56_v10  }
   0xd   :  { %610 = vmatpush3.msra.mxu0 %v29_v8  ;;  %100 = vperm.xlu1 %668, %v54_v12  }
   0xe   :  { %612 = vmatmul.mubr.msk.f32.vlgmr.msra.gmra.mxu0 %vm118_vm1, %v35_v11 }
   0xf   :  { %614 = vmatprep.mubr.msk.f32.mxu0 %vm118_vm1, %v36_v13 }
  0x10   :  { %14 = vsyncpa [#allocation4], 0  ;;  %95 = vperm.xlu0 %667, %v53_v14   ;;  %v51_v18 = vld [vmem:[%s902_s2 + $0x28] sm:$0xff]  ;;  %v50_v20 = vld [vmem:[%s902_s2 + $0x20] sm:$0xff]  ;;  %vm352_vm2 = vcmask 785408  }
  0x11   :  { %90 = vperm.xlu1 %668, %v52_v16   ;;  %v39_v19 = vld [vmem:[%s901_s1 + $0x28] sm:$0xff]  ;;  %v40_v21 = vld [vmem:[%s901_s1 + $0x30] sm:$0xff]  ;;  %v49_v22 = vld [vmem:[%s902_s2 + $0x18] sm:$0xff] }
  0x12   :  { %615 = vmatmul.mubr.msk.f32.gmra.mxu0 %vm118_vm1, %v37_v15  ;;  %v41_v23 = vld [vmem:[%s901_s1 + $0x38] sm:$0xff]  ;;  %v48_v24 = vld [vmem:[%s902_s2 + $0x10] sm:$0xff]  ;;  %v42_v25 = vld [vmem:[%s901_s1 + $0x40] sm:$0xff] }
  0x13   :  { %617 = vmatprep.mubr.msk.f32.mxu0 %vm118_vm1, %v38_v17  ;;  %v47_v26 = vld [vmem:[%s902_s2 + $0x8] sm:$0xff]  ;;  %v46_v28 = vld [vmem:[%s902_s2] sm:$0xff]  ;;  %v44_v29 = vld [vmem:[%s901_s1 + $0x50] sm:$0xff] }
  0x14   :  { %85 = vperm.xlu0 %667, %v51_v18   ;;  %v43_v27 = vld [vmem:[%s901_s1 + $0x48] sm:$0xff]  ;;  %v304_v30 = vld [vmem:[%s904_s4] sm:$0xff]  ;;  %v45_v31 = vld [vmem:[%s901_s1 + $0x58] sm:$0xff] }
  0x15   :  { %80 = vperm.xlu1 %668, %v50_v20   ;;  %v305_v32 = vld [vmem:[%s904_s4 + $0x8] sm:$0xff]  ;;  %v306_v33 = vld [vmem:[%s904_s4 + $0x10] sm:$0xff]  ;;  %v307_v34 = vld [vmem:[%s904_s4 + $0x18] sm:$0xff] }
  0x16   :  { %618 = vmatmul.mubr.msk.f32.gmra.mxu0 %vm118_vm1, %v39_v19  ;;  %v308_v35 = vld [vmem:[%s904_s4 + $0x20] sm:$0xff]  ;;  %v309_v36 = vld [vmem:[%s904_s4 + $0x28] sm:$0xff]  ;;  %v310_v37 = vld [vmem:[%s904_s4 + $0x30] sm:$0xff] }
  0x17   :  { %620 = vmatprep.mubr.msk.f32.mxu0 %vm118_vm1, %v40_v21  ;;  %v311_v38 = vld [vmem:[%s904_s4 + $0x38] sm:$0xff]  ;;  %v496_v39 = vld [vmem:[%s905_s5] sm:$0xff]  ;;  %v497_v40 = vld [vmem:[%s905_s5 + $0x8] sm:$0xff] }
  0x18   :  { %75 = vperm.xlu0 %667, %v49_v22   ;;  %v517_v41 = vld [vmem:[#allocation2] sm:$0x1] }
  0x19   :  { %70 = vperm.xlu1 %668, %v48_v24   ;;  %v296_v42 = vld [vmem:[%s903_s3] sm:$0xff] }
  0x1a   :  { %621 = vmatmul.mubr.msk.f32.gmra.mxu0 %vm118_vm1, %v41_v23  ;;  %653 = vmatprep.mubr.msk.f32.mxu1 %vm352_vm2, %v296_v42 }
  0x1b   :  { %623 = vmatprep.mubr.msk.f32.mxu0 %vm118_vm1, %v42_v25 }
  0x1c   :  { %65 = vperm.xlu0 %667, %v47_v26  }
  0x1d   :  { %60 = vperm.xlu1 %668, %v46_v28   ;;  %v298_v28 = vld [vmem:[%s903_s3 + $0x10] sm:$0xff] }
  0x1e   :  { %624 = vmatmul.mubr.msk.f32.gmra.mxu0 %vm118_vm1, %v43_v27  ;;  %v297_v27 = vld [vmem:[%s903_s3 + $0x8] sm:$0xff] }
  0x1f   :  { %626 = vmatprep.mubr.msk.f32.mxu0 %vm118_vm1, %v44_v29  ;;  %v299_v29 = vld [vmem:[%s903_s3 + $0x18] sm:$0xff] }
  0x20   :  { %314 = vperm.xlu0 %667, %v304_v30   ;;  %v300_v30 = vld [vmem:[%s903_s3 + $0x20] sm:$0xff] }
  0x21   :  { %319 = vperm.xlu1 %668, %v305_v32   ;;  %v302_v32 = vld [vmem:[%s903_s3 + $0x30] sm:$0xff] }
  0x22   :  { %627 = vmatmul.mubr.msk.f32.gmra.mxu0 %vm118_vm1, %v45_v31  ;;  %v301_v31 = vld [vmem:[%s903_s3 + $0x28] sm:$0xff] }
  0x24   :  { %324 = vperm.xlu0 %667, %v306_v33   ;;  %v303_v33 = vld [vmem:[%s903_s3 + $0x38] sm:$0xff]  ;;  %s692_s3 = smov [#allocation3]  }
  0x25   :  { %329 = vperm.xlu1 %668, %v307_v34   ;;  %s535_s16 = sshll.u32 %s692_s3, 4  ;;  %s536_s16 = int_to_ptr.vmem [resolvable:$true] %s535_s16 }
  0x26   :  { %s669_s17 = scalar_lea.vmem %s536_s16, 16  ;;  %s673_s18 = scalar_lea.vmem %s536_s16, 32 }
  0x27   :  { %p670_p0 = scmp.ne.s32.totalorder %s536_s16, %s669_s17  ;;  %p674_p1 = scmp.lt.s32.totalorder %s536_s16, %s536_s16 }
  0x28   :  { %334 = vperm.xlu0 %667, %v308_v35   ;;  %p675_p2 = scmp.lt.s32.totalorder %s673_s18, %s669_s17 }
  0x29   :  { %339 = vperm.xlu1 %668, %v309_v36  }
  0x2a   :  { %p676_p3 = por %p675_p2, %p674_p1 }
  0x2c   :  { %344 = vperm.xlu0 %667, %v310_v37   ;;  %p677_p4 = pnand %p676_p3, %p670_p0 }
  0x2d   :  { %349 = vperm.xlu1 %668, %v311_v38  }
  0x30   :  { %500 = vperm.xlu0 %667, %v496_v39  }
  0x31   :  { %505 = vperm.xlu1 %668, %v497_v40  }
  0x34   :  { %520 = vperm.xlu0 %667, %v517_v41  }
  0x83   :  { %v116_v47 = vpop.permute.xlu0 %115 }
  0x84   :  { %v106_v48 = vpop.permute.xlu1 %105 }
  0x87   :  { %v111_v52 = vpop.permute.xlu0 %110 }
  0x88   :  { %v101_v53 = vpop.permute.xlu1 %100 }
  0x8b   :  { %v96_v57 = vpop.permute.xlu0 %95 }
  0x8c   :  { %v91_v58 = vpop.permute.xlu1 %90 }
  0x8f   :  { %v86_v3 = vpop.permute.xlu0 %85 }
  0x90   :  { %v81_v4 = vpop.permute.xlu1 %80 }
  0x93   :  { %v76_v11 = vpop.permute.xlu0 %75 }
  0x94   :  { %v71_v12 = vpop.permute.xlu1 %70 }
  0x97   :  { %v66_v19 = vpop.permute.xlu0 %65 }
  0x98   :  { %v61_v20 = vpop.permute.xlu1 %60 }
  0x9b   :  { %v315_v35 = vpop.permute.xlu0 %314 }
  0x9c   :  { %v320_v34 = vpop.permute.xlu1 %319 }
  0x9f   :  { %v325_v38 = vpop.permute.xlu0 %324 }
  0xa0   :  { %v330_v36 = vpop.permute.xlu1 %329 }
  0xa4   :  { %v340_v41 = vpop.permute.xlu1 %339 }
  0xce   :  { %v613_v43 = vpop.f32.mrf.mxu0 }
  0xcf   :  { %v231_v21 = vadd.f32 %v613_v43, %v66_v19  ;;  %v335_v43 = vpop.permute.xlu0 %334 }
  0xd0   :  { %v225_v44 = vpop.f32.mrf.mxu0 }
  0xd1   :  { %v226_v23 = vadd.f32 %v225_v44, %v61_v20  ;;  %v285_v25 = vmax.f32 %v231_v21, 0.0 }
  0xd2   :  { %v616_v45 = vpop.f32.mrf.mxu0 }
  0xd3   :  { %v241_v15 = vadd.f32 %v616_v45, %v76_v11  ;;  %v284_v26 = vmax.f32 %v226_v23, 0.0 }
  0xd4   :  { %v235_v46 = vpop.f32.mrf.mxu0 }
  0xd5   :  { %v236_v17 = vadd.f32 %v235_v46, %v71_v12  ;;  %v287_v22 = vmax.f32 %v241_v15, 0.0  ;;  %v523_v12 = vlaneseq }
  0xd6   :  { %v619_v49 = vpop.f32.mrf.mxu0 }
  0xd7   :  { %v251_v9 = vadd.f32 %v619_v49, %v86_v3  ;;  %v286_v24 = vmax.f32 %v236_v17, 0.0  ;;  %v524_v15 = vshrl.u32 %v523_v12, 7 }
  0xd8   :  { %v245_v50 = vpop.f32.mrf.mxu0 }
  0xd9   :  { %v246_v13 = vadd.f32 %v245_v50, %v81_v4  ;;  %v289_v16 = vmax.f32 %v251_v9, 0.0  ;;  %v350_v50 = vpop.permute.xlu1 %349 }
  0xda   :  { %v622_v51 = vpop.f32.mrf.mxu0 }
  0xdb   :  { %v261_v5 = vadd.f32 %v622_v51, %v96_v57  ;;  %v288_v18 = vmax.f32 %v246_v13, 0.0 }
  0xdc   :  { %v255_v54 = vpop.f32.mrf.mxu0 }
  0xdd   :  { %v256_v7 = vadd.f32 %v255_v54, %v91_v58  ;;  %v291_v10 = vmax.f32 %v261_v5, 0.0  ;;  %v506_v9 = vpop.permute.xlu1 %505 }
  0xde   :  { %v625_v55 = vpop.f32.mrf.mxu0 }
  0xdf   :  { %v271_v62 = vadd.f32 %v625_v55, %v106_v48  ;;  %v290_v14 = vmax.f32 %v256_v7, 0.0 }
  0xe0   :  { %v265_v56 = vpop.f32.mrf.mxu0 }
  0xe1   :  { %v266_v1 = vadd.f32 %v265_v56, %v101_v53  ;;  %v293_v6 = vmax.f32 %v271_v62, 0.0  ;;  %v345_v56 = vpop.permute.xlu0 %344 }
  0xe2   :  { %v628_v59 = vpop.f32.mrf.mxu0 }
  0xe3   :  { %v281_v60 = vadd.f32 %v628_v59, %v116_v47  ;;  %v292_v8 = vmax.f32 %v266_v1, 0.0 }
  0xe4   :  { %v275_v61 = vpop.f32.mrf.mxu0 }
  0xe5   :  { %v295_v63 = vmax.f32 %v281_v60, 0.0  ;;  %v276_v0 = vadd.f32 %v275_v61, %v111_v52 }
  0xe7   :  { %v294_v2 = vmax.f32 %v276_v0, 0.0  ;;  %629 = vmatprep.subr.mxu1 %v295_v63 }
  0xe8   :  { %630 = vmatpush3.msra.mxu1 %v295_v63 }
  0xe9   :  { %631 = vmatprep.subr.mxu1 %v294_v2 }
  0xea   :  { %632 = vmatpush3.msra.mxu1 %v294_v2 }
  0xeb   :  { %633 = vmatprep.subr.mxu1 %v293_v6 }
  0xec   :  { %634 = vmatpush3.msra.mxu1 %v293_v6 }
  0xed   :  { %635 = vmatprep.subr.mxu1 %v292_v8 }
  0xee   :  { %636 = vmatpush3.msra.mxu1 %v292_v8  ;;  %v501_v8 = vpop.permute.xlu0 %500 }
  0xef   :  { %637 = vmatprep.subr.mxu1 %v291_v10 }
  0xf0   :  { %638 = vmatpush3.msra.mxu1 %v291_v10 }
  0xf1   :  { %639 = vmatprep.subr.mxu1 %v290_v14 }
  0xf2   :  { %640 = vmatpush3.msra.mxu1 %v290_v14  ;;  %v521_v20 = vpop.permute.xlu0 %520 }
  0xf3   :  { %641 = vmatprep.subr.mxu1 %v289_v16 }
  0xf4   :  { %642 = vmatpush3.msra.mxu1 %v289_v16 }
  0xf5   :  { %643 = vmatprep.subr.mxu1 %v288_v18 }
  0xf6   :  { %644 = vmatpush3.msra.mxu1 %v288_v18  ;;  %v525_v18 = vsub.s32 0, %v524_v15 }
  0xf7   :  { %645 = vmatprep.subr.mxu1 %v287_v22 }
  0xf8   :  { %646 = vmatpush3.msra.mxu1 %v287_v22  ;;  %v526_v22 = vrot.slane %v521_v20, %v525_v18 }
  0xf9   :  { %647 = vmatprep.subr.mxu1 %v286_v24 }
  0xfa   :  { %648 = vmatpush3.msra.mxu1 %v286_v24 }
  0xfb   :  { %649 = vmatprep.subr.mxu1 %v285_v25 }
  0xfc   :  { %650 = vmatpush3.msra.mxu1 %v285_v25 }
  0xfd   :  { %651 = vmatprep.subr.mxu1 %v284_v26 }
  0xfe   :  { %652 = vmatpush3.msra.mxu1 %v284_v26 }
  0xff   :  { %654 = vmatmul.mubr.msk.f32.vlgmr.msra.gmra.mxu1 %vm352_vm2, %v297_v27 }
 0x100   :  { %656 = vmatprep.mubr.msk.f32.mxu1 %vm352_vm2, %v298_v28 }
 0x103   :  { %657 = vmatmul.mubr.msk.f32.gmra.mxu1 %vm352_vm2, %v299_v29 }
 0x104   :  { %659 = vmatprep.mubr.msk.f32.mxu1 %vm352_vm2, %v300_v30 }
 0x107   :  { %660 = vmatmul.mubr.msk.f32.gmra.mxu1 %vm352_vm2, %v301_v31 }
 0x108   :  { %662 = vmatprep.mubr.msk.f32.mxu1 %vm352_vm2, %v302_v32 }
 0x10b   :  { %663 = vmatmul.mubr.msk.f32.gmra.mxu1 %vm352_vm2, %v303_v33 }
 0x1bf   :  { %v655_v37 = vpop.f32.mrf.mxu1 }
 0x1c0   :  { %v449_v46 = vadd.f32 %v655_v37, %v320_v34 }
 0x1c1   :  { %v443_v39 = vpop.f32.mrf.mxu1 }
 0x1c2   :  { %v444_v51 = vadd.f32 %v443_v39, %v315_v35  ;;  %v483_v57 = vmax.f32 %v449_v46, 0.0 }
 0x1c3   :  { %v658_v40 = vpop.f32.mrf.mxu1 }
 0x1c4   :  { %v459_v45 = vadd.f32 %v658_v40, %v330_v36  ;;  %v482_v63 = vmax.f32 %v444_v51, 0.0 }
 0x1c5   :  { %v453_v42 = vpop.f32.mrf.mxu1 }
 0x1c6   :  { %v454_v48 = vadd.f32 %v453_v42, %v325_v38  ;;  %v485_v53 = vmax.f32 %v459_v45, 0.0 }
 0x1c7   :  { %v661_v44 = vpop.f32.mrf.mxu1 }
 0x1c8   :  { %v469_v49 = vadd.f32 %v661_v44, %v340_v41  ;;  %v484_v59 = vmax.f32 %v454_v48, 0.0  ;;  %v491_v0 = vmax.f32 %v483_v57, %v485_v53 }
 0x1c9   :  { %v463_v47 = vpop.f32.mrf.mxu1 }
 0x1ca   :  { %v464_v54 = vadd.f32 %v463_v47, %v335_v43  ;;  %v487_v60 = vmax.f32 %v469_v49, 0.0  ;;  %v490_v4 = vmax.f32 %v482_v63, %v484_v59 }
 0x1cb   :  { %v664_v52 = vpop.f32.mrf.mxu1 }
 0x1cc   :  { %v479_v55 = vadd.f32 %v664_v52, %v350_v50  ;;  %v486_v1 = vmax.f32 %v464_v54, 0.0 }
 0x1cd   :  { %v473_v58 = vpop.f32.mrf.mxu1 }
 0x1ce   :  { %v489_v61 = vmax.f32 %v479_v55, 0.0  ;;  %v474_v62 = vadd.f32 %v473_v58, %v345_v56 }
 0x1d0   :  { %v493_v2 = vmax.f32 %v487_v60, %v489_v61  ;;  %v488_v3 = vmax.f32 %v474_v62, 0.0 }
 0x1d2   :  { %v495_v5 = vmax.f32 %v491_v0, %v493_v2  ;;  %v492_v6 = vmax.f32 %v486_v1, %v488_v3 }
 0x1d4   :  { %v494_v7 = vmax.f32 %v490_v4, %v492_v6  ;;  %v509_v10 = vmul.f32 %v506_v9, %v495_v5 }
 0x1d6   :  { %v508_v11 = vmul.f32 %v501_v8, %v494_v7 }
 0x1d8   :  { %v510_v13 = vadd.f32 %v509_v10, %v508_v11 }
 0x1da   :  { %v511_v14 = vrot.slane %v510_v13, 4 }
 0x1dc   :  { %v512_v16 = vadd.f32 %v511_v14, %v510_v13 }
 0x1de   :  { %v513_v17 = vrot.slane %v512_v16, 2 }
 0x1e0   :  { %v514_v19 = vadd.f32 %v513_v17, %v512_v16 }
 0x1e2   :  { %v515_v21 = vrot.slane %v514_v19, 1 }
 0x1e4   :  { %v516_v23 = vadd.f32 %v515_v21, %v514_v19 }
 0x1e6   :  { %v527_v24 = vadd.f32 %v526_v22, %v516_v23 }
 0x1e8   :  { %528 = vst [vmem:[#allocation3] sm:$0x1] %v527_v24 }
 0x1e9   :  { %680 = shalt.err (!%p677_p4)
}
 0x1ea   :  { %538 = dma.vmem_to_hbm [thread:$0]  %s536_s16, 16, %s907_s7, [#allocation4]  }
 0x1eb   :  { %689 = dma.done.wait [#allocation4], 16  }
 0x1ec   :  { %690 = vsyncadd [#allocation4], 4294967280 }
 0x1ed   :  { %542 = vsyncpa [#allocation4], 1 }

</bundles_post_ra>
